<compile_context>
chip_gen: v5e
topology: v5e:2x2
jax: 0.10.0
libtpu: 0.0.40
codegen_flags: <defaults>
</compile_context>

<pallas_src>
import math

import jax
import jax.numpy as jnp
from jax.experimental import pallas as pl
from jax.experimental.pallas import tpu as pltpu

_LANE = 128


def _round_up(x, m):
    return ((x + m - 1) // m) * m


def _fused_conv_sigmoid_kernel(x_ref, w1_ref, b1_ref, w2_ref, b2_ref, o_ref):
    # x_ref:  (3,  tm)   one spatial tile, channels on sublanes, pixels on lanes
    # w1_ref: (16, 3), b1_ref: (16, 1)   (full arrays, resident in VMEM)
    # w2_ref: (8, 16), b2_ref: (8, 1)
    # o_ref:  (8,  tm)
    x = x_ref[...]

    # t1 = conv1(x)   (1x1 conv == channel matmul) ; t2 = sigmoid(t1)
    t1 = jnp.dot(w1_ref[...], x, preferred_element_type=jnp.float32) + b1_ref[...]
    t2 = jax.nn.sigmoid(t1)

    # t4 = sigmoid(t2)
    t4 = jax.nn.sigmoid(t2)

    # t5 = conv2(t4) ; t6 = sigmoid(t5)
    t5 = jnp.dot(w2_ref[...], t4, preferred_element_type=jnp.float32) + b2_ref[...]
    o_ref[...] = jax.nn.sigmoid(t5)


def model_forward(x_nchw, w1, b1, w2, b2, *, max_tm=32768):
    """x_nchw: (N, 3, H, W) float32 -> (N, 8, H, W) float32 (the valid t6)."""
    N, C, H, W = x_nchw.shape
    assert C == 3
    HW = H * W

    # (N, C, H, W) -> (N, C, H*W): a pure reshape, no HBM transpose.
    x = x_nchw.reshape(N, C, HW)

    # Pick the largest lane-dense tile (multiple of 128) up to max_tm, but keep
    # at least 2 total grid steps so both v7x TensorCores get work.
    tm = min(max_tm, _round_up(HW, _LANE))
    while N * pl.cdiv(HW, tm) < 2 and tm > _LANE:
        tm = _round_up(tm // 2, _LANE)

    # Pad the spatial axis up to a multiple of the tile (sliced off afterward).
    hw_pad = _round_up(HW, tm)
    if hw_pad != HW:
        x = jnp.pad(x, ((0, 0), (0, 0), (0, hw_pad - HW)))

    grid = (N, hw_pad // tm)
    M = N * hw_pad

    cost = pl.CostEstimate(
        flops=2 * M * (16 * 3 + 8 * 16),
        transcendentals=M * (16 + 16 + 8),  # three sigmoid tensors
        bytes_accessed=4 * (3 * M + 8 * M) + 4 * (16 * 3 + 16 + 8 * 16 + 8),
    )

    # Tiny weights/biases: resident, untiled VMEM operands.
    vmem_spec = pl.BlockSpec(memory_space=pltpu.MemorySpace.VMEM)

    out_flat = pl.pallas_call(
        _fused_conv_sigmoid_kernel,
        out_shape=jax.ShapeDtypeStruct((N, 8, hw_pad), jnp.float32),
        grid_spec=pltpu.PrefetchScalarGridSpec(
            num_scalar_prefetch=0,
            grid=grid,
            in_specs=[
                pl.BlockSpec((pl.Squeezed(), C, tm), lambda n, i: (n, 0, i)),  # x
                vmem_spec,  # conv1 weight (16, 3)
                vmem_spec,  # conv1 bias   (16, 1)
                vmem_spec,  # conv2 weight (8, 16)
                vmem_spec,  # conv2 bias   (8, 1)
            ],
            out_specs=pl.BlockSpec((pl.Squeezed(), 8, tm), lambda n, i: (n, 0, i)),
        ),
        compiler_params=pltpu.CompilerParams(
            dimension_semantics=("parallel", "parallel")),
        cost_estimate=cost,
    )(x, w1, b1, w2, b2)

    # (N, 8, hw_pad) -> (N, 8, H, W)  (drop padded pixels, pure reshape)
    return out_flat[:, :, :HW].reshape(N, 8, H, W)


def _reference(x_nchw, w1, b1, w2, b2):
    """Plain-JAX reference of the same valid chain (for verification)."""
    t1 = jnp.einsum("oc,nchw->nohw", w1, x_nchw) + b1.reshape(1, -1, 1, 1)
    t2 = jax.nn.sigmoid(t1)
    t4 = jax.nn.sigmoid(t2)
    t5 = jnp.einsum("oc,nohw->nchw".replace("c", "p").replace("o", "c").replace("p", "o"),
                    w2, t4) if False else (
        jnp.einsum("oc,nchw->nohw", w2, t4))
    t5 = t5 + b2.reshape(1, -1, 1, 1)
    return jax.nn.sigmoid(t5)


if __name__ == "__main__":
    key = jax.random.PRNGKey(0)
    kx, k1, k2, k3, k4 = jax.random.split(key, 5)

    # Small example input consistent with the module (3 input channels, NCHW).
    N, C, H, W = 2, 3, 32, 32
    x = jax.random.normal(kx, (N, C, H, W), dtype=jnp.float32)

    # Deterministic parameter init (PyTorch-style uniform(-1/sqrt(fan_in), ...))
    bound1 = 1.0 / math.sqrt(3.0)
    w1 = jax.random.uniform(k1, (16, 3), jnp.float32, -bound1, bound1)
    b1 = jax.random.uniform(k2, (16, 1), jnp.float32, -bound1, bound1)
    bound2 = 1.0 / math.sqrt(16.0)
    w2 = jax.random.uniform(k3, (8, 16), jnp.float32, -bound2, bound2)
    b2 = jax.random.uniform(k4, (8, 1), jnp.float32, -bound2, bound2)

    out = jax.block_until_ready(model_forward(x, w1, b1, w2, b2))
    ref = jax.block_until_ready(_reference(x, w1, b1, w2, b2))
    assert out.shape == (N, 8, H, W)
    assert jnp.allclose(out, ref, atol=1e-5, rtol=1e-5)

    # The module's original shape (N=1): spatial axis split into >=2 tiles.
    x1 = jax.random.normal(kx, (1, 3, 64, 64), dtype=jnp.float32)
    out1 = jax.block_until_ready(model_forward(x1, w1, b1, w2, b2))
    assert jnp.allclose(out1, _reference(x1, w1, b1, w2, b2), atol=1e-5, rtol=1e-5)

    # Unaligned spatial size: exercises the padded-tail path.
    x2 = jax.random.normal(kx, (2, 3, 10, 10), dtype=jnp.float32)
    out2 = jax.block_until_ready(model_forward(x2, w1, b1, w2, b2))
    assert jnp.allclose(out2, _reference(x2, w1, b1, w2, b2), atol=1e-5, rtol=1e-5)

    print("KERNEL_OK")
</pallas_src>

<mosaic_0001>
module attributes {stable_mosaic.version = 11 : i64} {
  func.func @_fused_conv_sigmoid_kernel(%arg0: i32, %arg1: i32, %arg2: memref<1x3x1024xf32, #tpu.memory_space<vmem>>, %arg3: memref<16x3xf32, #tpu.memory_space<vmem>>, %arg4: memref<16x1xf32, #tpu.memory_space<vmem>>, %arg5: memref<8x16xf32, #tpu.memory_space<vmem>>, %arg6: memref<8x1xf32, #tpu.memory_space<vmem>>, %arg7: memref<1x8x1024xf32, #tpu.memory_space<vmem>>) attributes {dimension_semantics = [#tpu.dimension_semantics<parallel>, #tpu.dimension_semantics<parallel>], iteration_bounds = array<i64: 2, 1>, scalar_prefetch = 0 : i64, scratch_operands = 0 : i64, tpu.core_type = #tpu.core_type<tc>, window_params = [{transform_indices = @transform_0, window_bounds = array<i64: 1, 3, 1024>}, {pipeline_mode = #tpu.pipeline_mode<synchronous>, transform_indices = @transform_1, window_bounds = array<i64: 16, 3>}, {pipeline_mode = #tpu.pipeline_mode<synchronous>, transform_indices = @transform_2, window_bounds = array<i64: 16, 1>}, {pipeline_mode = #tpu.pipeline_mode<synchronous>, transform_indices = @transform_3, window_bounds = array<i64: 8, 16>}, {pipeline_mode = #tpu.pipeline_mode<synchronous>, transform_indices = @transform_4, window_bounds = array<i64: 8, 1>}, {transform_indices = @transform_5, window_bounds = array<i64: 1, 8, 1024>}]} {
    %c0 = arith.constant 0 : index
    %c0_0 = arith.constant 0 : index
    %c0_1 = arith.constant 0 : index
    %0 = vector.load %arg2[%c0, %c0_0, %c0_1] : memref<1x3x1024xf32, #tpu.memory_space<vmem>>, vector<1x3x1024xf32>
    %1 = vector.shape_cast %0 : vector<1x3x1024xf32> to vector<3x1024xf32>
    %c0_2 = arith.constant 0 : index
    %c0_3 = arith.constant 0 : index
    %2 = vector.load %arg3[%c0_2, %c0_3] : memref<16x3xf32, #tpu.memory_space<vmem>>, vector<16x3xf32>
    %cst = arith.constant dense<0.000000e+00> : vector<16x1024xf32>
    %3 = tpu.matmul %2, %1, %cst {dimension_numbers = #tpu.dot_dimension_numbers<[1], [0], [0], [1], [0, 0, 1, 1], [], []>} : vector<16x3xf32>, vector<3x1024xf32>, vector<16x1024xf32> -> vector<16x1024xf32>
    %c0_4 = arith.constant 0 : index
    %c0_5 = arith.constant 0 : index
    %4 = vector.load %arg4[%c0_4, %c0_5] : memref<16x1xf32, #tpu.memory_space<vmem>>, vector<16x1xf32>
    %5 = vector.broadcast %4 : vector<16x1xf32> to vector<16x1024xf32>
    %6 = arith.addf %3, %5 : vector<16x1024xf32>
    %7 = arith.negf %6 : vector<16x1024xf32>
    %8 = math.exp %7 : vector<16x1024xf32>
    %cst_6 = arith.constant 1.000000e+00 : f32
    %9 = vector.broadcast %cst_6 : f32 to vector<16x1024xf32>
    %10 = arith.addf %9, %8 : vector<16x1024xf32>
    %11 = arith.divf %9, %10 : vector<16x1024xf32>
    %12 = arith.negf %11 : vector<16x1024xf32>
    %13 = math.exp %12 : vector<16x1024xf32>
    %cst_7 = arith.constant 1.000000e+00 : f32
    %14 = vector.broadcast %cst_7 : f32 to vector<16x1024xf32>
    %15 = arith.addf %14, %13 : vector<16x1024xf32>
    %16 = arith.divf %14, %15 : vector<16x1024xf32>
    %c0_8 = arith.constant 0 : index
    %c0_9 = arith.constant 0 : index
    %17 = vector.load %arg5[%c0_8, %c0_9] : memref<8x16xf32, #tpu.memory_space<vmem>>, vector<8x16xf32>
    %cst_10 = arith.constant dense<0.000000e+00> : vector<8x1024xf32>
    %18 = tpu.matmul %17, %16, %cst_10 {dimension_numbers = #tpu.dot_dimension_numbers<[1], [0], [0], [1], [0, 0, 1, 1], [], []>} : vector<8x16xf32>, vector<16x1024xf32>, vector<8x1024xf32> -> vector<8x1024xf32>
    %c0_11 = arith.constant 0 : index
    %c0_12 = arith.constant 0 : index
    %19 = vector.load %arg6[%c0_11, %c0_12] : memref<8x1xf32, #tpu.memory_space<vmem>>, vector<8x1xf32>
    %20 = vector.broadcast %19 : vector<8x1xf32> to vector<8x1024xf32>
    %21 = arith.addf %18, %20 : vector<8x1024xf32>
    %22 = arith.negf %21 : vector<8x1024xf32>
    %23 = math.exp %22 : vector<8x1024xf32>
    %cst_13 = arith.constant 1.000000e+00 : f32
    %24 = vector.broadcast %cst_13 : f32 to vector<8x1024xf32>
    %25 = arith.addf %24, %23 : vector<8x1024xf32>
    %26 = arith.divf %24, %25 : vector<8x1024xf32>
    %c0_14 = arith.constant 0 : index
    %c0_15 = arith.constant 0 : index
    %c0_16 = arith.constant 0 : index
    %27 = vector.load %arg7[%c0_14, %c0_15, %c0_16] : memref<1x8x1024xf32, #tpu.memory_space<vmem>>, vector<1x8x1024xf32>
    %28 = vector.shape_cast %27 : vector<1x8x1024xf32> to vector<8x1024xf32>
    %29 = vector.shape_cast %26 : vector<8x1024xf32> to vector<1x8x1024xf32>
    tpu.vector_store %arg7[%c0_14, %c0_15, %c0_16], %29 {strides = array<i32>} : memref<1x8x1024xf32, #tpu.memory_space<vmem>>, vector<1x8x1024xf32>,
    return
  }
  func.func @transform_0(%arg0: i32, %arg1: i32) -> (i32, i32, i32) {
    %c0_i32 = arith.constant 0 : i32
    %c0_i32_0 = arith.constant 0 : i32
    return %arg0, %c0_i32, %arg1 : i32, i32, i32
  }
  func.func @transform_1(%arg0: i32, %arg1: i32) -> (i32, i32) {
    %c0_i32 = arith.constant 0 : i32
    %c0_i32_0 = arith.constant 0 : i32
    %c0_i32_1 = arith.constant 0 : i32
    return %c0_i32, %c0_i32_0 : i32, i32
  }
  func.func @transform_2(%arg0: i32, %arg1: i32) -> (i32, i32) {
    %c0_i32 = arith.constant 0 : i32
    %c0_i32_0 = arith.constant 0 : i32
    %c0_i32_1 = arith.constant 0 : i32
    return %c0_i32, %c0_i32_0 : i32, i32
  }
  func.func @transform_3(%arg0: i32, %arg1: i32) -> (i32, i32) {
    %c0_i32 = arith.constant 0 : i32
    %c0_i32_0 = arith.constant 0 : i32
    %c0_i32_1 = arith.constant 0 : i32
    return %c0_i32, %c0_i32_0 : i32, i32
  }
  func.func @transform_4(%arg0: i32, %arg1: i32) -> (i32, i32) {
    %c0_i32 = arith.constant 0 : i32
    %c0_i32_0 = arith.constant 0 : i32
    %c0_i32_1 = arith.constant 0 : i32
    return %c0_i32, %c0_i32_0 : i32, i32
  }
  func.func @transform_5(%arg0: i32, %arg1: i32) -> (i32, i32, i32) {
    %c0_i32 = arith.constant 0 : i32
    %c0_i32_0 = arith.constant 0 : i32
    return %arg0, %c0_i32, %arg1 : i32, i32, i32
  }
}

</mosaic_0001>

<bundles_post_ra>
// kernel: tpu_custom_call.1
= control target key start
LH: loop header
LB: loop body
LE: loop exit
PB: predicated region body
PF: predicated region fallthrough
CT: control target
= control target key end

     0   :  { %10 = vsyncpa [#allocation3], 0  ;;  %s2816_s0 = inlined_call_operand.vmem [shape: f32[2,3,1024], index: 0, kind: input, shape index: {}]   ;;  %s2817_s1 = inlined_call_operand.vmem [shape: f32[16,3], index: 1, kind: input, shape index: {}]   ;;  %s2818_s2 = inlined_call_operand.vmem [shape: f32[16,1], index: 2, kind: input, shape index: {}]   ;;  %s2819_s3 = inlined_call_operand.vmem [shape: f32[8,16], index: 3, kind: input, shape index: {}]   ;;  %s2820_s4 = inlined_call_operand.vmem [shape: f32[8,1], index: 4, kind: input, shape index: {}]   ;;  %s2821_s5 = inlined_call_operand.hbm [shape: f32[2,8,1024], index: 5, kind: output, shape index: {}]  }
   0x1   :  { %12 = vsyncpa [#allocation3 + $0x1], 0  ;;  %s1949_s18 = smov 0   ;;  %s1951_s19 = smov 0  }
   0x2   :  { %s1953_s20 = smov 0   ;;  %s1955_s21 = smov 0  }
   0x3   :  { %s1957_s22 = smov 0   ;;  %s1959_s23 = smov 0  }
   0x4 LB: > { %s1533_s24 = sadd.s32 4294967295, %s1916_s23   ;;  %s1534_s25 = sadd.s32 4294967294, %s1916_s23   ;;  %s1916_s23 = sphi %s1959_s23, %s18_s23   ;;  %s1912_s22 = sphi %s1957_s22, %s2904_s22   ;;  %s1908_s21 = sphi %s1955_s21, %s2903_s21   ;;  %s1904_s20 = sphi %s1953_s20, %s2902_s20   ;;  %s1900_s19 = sphi %s1951_s19, %s2901_s19   ;;  %s1896_s18 = sphi %s1949_s18, %s2900_s18  }
   0x5   : > { %s30_s26 = sadd.s32 1, %s1912_s22  ;;  %s151_s27 = sadd.s32 1, %s1904_s20 }
   0x6   : > { %p32_p0 = scmp.ge.s32.totalorder %s30_s26, 2  ;;  %p161_p1 = scmp.ne.s32.totalorder %s1904_s20, %s1900_s19 }
   0x7   : > { %p162_p2 = scmp.eq.s32.totalorder %s1533_s24, 1  ;;  %p167_p3 = scmp.ne.s32.totalorder %s1900_s19, %s1896_s18 }
   0x8   : > { %s2906_s26 = smov (%p32_p0, %s30_s26), 0  ;;  %p168_p5 = scmp.eq.s32.totalorder %s1534_s25, 1 }
   0x9   : > { %p1989_p4 = por %p162_p2, %p161_p1  ;;  %s146_s29 = ssub.s32 %s1912_s22, %s2906_s26 }
   0xa   : > { %p1537_p6 = scmp.ge.s32.totalorder %s1916_s23, 1  ;;  %p149_p7 = scmp.eq.s32.totalorder %s146_s29, 0 }
   0xb   : > { %p1996_p8 = por %p168_p5, %p167_p3  ;;  %p211_p9 = scmp.lt.s32.totalorder %s1916_s23, 3 }
   0xc   : > { %s2002_s6 = scalar_select %p149_p7, %s1904_s20, %s151_s27  }
   0xd   : > { %p212_p10 = pnand %p1537_p6, %p211_p9 }
   0xe   : > { %p244_p11 = scmp.lt.s32.totalorder (!%p212_p10), %s1908_s21, 1  ;;  %s1619_s12 = sshll.u32 (!%p212_p10), %s1908_s21, 6 }
   0xf   : > { %215 = sbr.rel (%p212_p10) target bundleno = 472 (0x1d8), region = 40  ;;  %s1452_s15 = scalar_lea.hbm (!%p212_p10), %s2821_s5, %s1619_s12 }
  0x10   : > { %s1456_s16 = sshll.u32 (!%p212_p10), %s1452_s15, 4  ;;  %s1858_s7 = scalar_lea.hbm (!%p212_p10), %s2821_s5, 128  ;;  %s1457_s16 = int_to_ptr.hbm [resolvable:$true] %s1456_s16 }
  0x11   : > { %s1852_s24 = sshra.s32 (!%p212_p10), %s1457_s16, 4  ;;  %s1853_s24 = int_to_ptr.hbm [resolvable:$true] %s1852_s24 }
  0x12   : > { %s1854_s25 = scalar_lea.hbm (!%p212_p10), %s1853_s24, 64  ;;  %p1859_p1 = scmp.lt.s32.totalorder (!%p212_p10), %s1853_s24, %s2821_s5 }
  0x13   : > { %p1855_p12 = scmp.ne.s32.totalorder (!%p212_p10), %s1853_s24, %s1854_s25  ;;  %p1860_p2 = scmp.lt.s32.totalorder (!%p212_p10), %s1858_s7, %s1854_s25 }
  0x14   : > { %v261_v0 = vld [vmem:[%s2818_s2 + $0x8] sm:$0xff]  ;;  %v1918_v1 = vmov 0   ;;  %s245_s9 = scalar_select %p244_p11, %s1908_s21, 1  ;;  %v260_v5 = vld [vmem:[%s2818_s2] sm:$0xff]  ;;  %vm298_vm0 = vcmask 1042432   ;;  %vm291_vm1 = vcmask 23552  }
  0x15   : > { %1676 = vset.pattern.permute.xlu0 %v1918_v1  ;;  %1677 = vset.pattern.permute.xlu1 %v1918_v1  ;;  %v258_v7 = vld [vmem:[%s2817_s1] sm:$0xff]  ;;  %v259_v16 = vld [vmem:[%s2817_s1 + $0x8] sm:$0xff]  ;;  %p1856_p13 = pnand %p1855_p12, %p1989_p4  ;;  %p1861_p3 = por %p1860_p2, %p1859_p1 }
  0x16   : > { %269 = vperm.xlu0 %1676, %v261_v0   ;;  %s1618_s10 = sshll.u32 %s245_s9, 5  ;;  %s240_s9 = sand.u32 1, %s1900_s19  }
  0x17   : > { %s251_s13 = scalar_lea.vmem %s2816_s0, %s1618_s10  ;;  %s1538_s10 = sshll.u32 %s240_s9, 6 }
  0x18   : > { %v254_v2 = vld [vmem:[%s251_s13] sm:$0x77]  ;;  %v255_v3 = vld [vmem:[%s251_s13 + $0x8] sm:$0x77]  ;;  %v257_v4 = vld [vmem:[%s251_s13 + $0x18] sm:$0x77]  ;;  %p1857_p0 = pneg %p1856_p13 }
  0x19   : > { %276 = vst [vmem:[#allocation1] ss:$2 sm:$0xff] %v254_v2  ;;  %v256_v6 = vld [vmem:[%s251_s13 + $0x10] sm:$0x77]  ;;  %s2762_s11 = scalar_lea.vmem [#allocation2], %s1538_s10  ;;  %s1439_s17 = scalar_lea.sflag [#allocation3], %s240_s9 }
  0x1a   : > { %278 = vst [vmem:[#allocation1 + $0x10] ss:$2 sm:$0xff] %v255_v3  ;;  %s1454_s21 = sshll.u32 %s2762_s11, 4  ;;  %p1862_p5 = pnand %p1861_p3, %p1857_p0  ;;  %s1455_s21 = int_to_ptr.vmem [resolvable:$true] %s1454_s21 }
  0x1b   : > { %282 = vst [vmem:[#allocation1 + $0x30] ss:$2 sm:$0xff] %v257_v4 }
  0x1c   : > { %280 = vst [vmem:[#allocation1 + $0x20] ss:$2 sm:$0xff] %v256_v6 }
  0x1e   : > { %264 = vperm.xlu0 %1676, %v260_v5  }
  0x20   : > { %v283_v8 = vld.sshfl [vmem:[#allocation1] sm:$0xff pattern:$0x75316420]  ;;  %v284_v9 = vld.sshfl [vmem:[#allocation1 + $0x8] sm:$0xff pattern:$0x75316420] }
  0x21   : > { %1541 = vmatpush.msk.msra.mxu0 %vm298_vm0, %v283_v8  ;;  %1544 = vmatpush.msk.msra.mxu1 %vm298_vm0, %v284_v9  ;;  %v285_v10 = vld.sshfl [vmem:[#allocation1 + $0x10] sm:$0xff pattern:$0x75316420]  ;;  %v286_v11 = vld.sshfl [vmem:[#allocation1 + $0x18] sm:$0xff pattern:$0x75316420] }
  0x22   : > { %1547 = vmatpush.msk.msra.mxu2 %vm298_vm0, %v285_v10  ;;  %1550 = vmatpush.msk.msra.mxu3 %vm298_vm0, %v286_v11  ;;  %v289_v12 = vld.sshfl [vmem:[#allocation1 + $0x30] sm:$0xff pattern:$0x75316420]  ;;  %v290_v13 = vld.sshfl [vmem:[#allocation1 + $0x38] sm:$0xff pattern:$0x75316420] }
  0x23   : > { %1542 = vmatmul.msk.f32.vlgmr.msra.gmra.mxu0 %vm291_vm1, %v258_v7  ;;  %1545 = vmatmul.msk.f32.vlgmr.msra.gmra.mxu1 %vm291_vm1, %v258_v7  ;;  %v287_v14 = vld.sshfl [vmem:[#allocation1 + $0x20] sm:$0xff pattern:$0x75316420]  ;;  %v288_v15 = vld.sshfl [vmem:[#allocation1 + $0x28] sm:$0xff pattern:$0x75316420] }
  0x24   : > { %1548 = vmatmul.msk.f32.vlgmr.msra.gmra.mxu2 %vm291_vm1, %v258_v7  ;;  %1551 = vmatmul.msk.f32.vlgmr.msra.gmra.mxu3 %vm291_vm1, %v258_v7 }
  0x25   : > { %1559 = vmatpush.msk.msrb.mxu2 %vm298_vm0, %v289_v12  ;;  %1562 = vmatpush.msk.msrb.mxu3 %vm298_vm0, %v290_v13 }
  0x26   : > { %1553 = vmatpush.msk.msrb.mxu0 %vm298_vm0, %v287_v14  ;;  %1556 = vmatpush.msk.msrb.mxu1 %vm298_vm0, %v288_v15 }
  0x2b   : > { %1543 = vmatmul.msk.f32.gmra.mxu0 %vm291_vm1, %v259_v16  ;;  %1546 = vmatmul.msk.f32.gmra.mxu1 %vm291_vm1, %v259_v16 }
  0x2c   : > { %1549 = vmatmul.msk.f32.gmra.mxu2 %vm291_vm1, %v259_v16  ;;  %1552 = vmatmul.msk.f32.gmra.mxu3 %vm291_vm1, %v259_v16 }
  0x33   : > { %1554 = vmatmul.msk.f32.vlgmr.msrb.gmra.mxu0 %vm291_vm1, %v258_v7  ;;  %1557 = vmatmul.msk.f32.vlgmr.msrb.gmra.mxu1 %vm291_vm1, %v258_v7 }
  0x34   : > { %1560 = vmatmul.msk.f32.vlgmr.msrb.gmra.mxu2 %vm291_vm1, %v258_v7  ;;  %1563 = vmatmul.msk.f32.vlgmr.msrb.gmra.mxu3 %vm291_vm1, %v258_v7 }
  0x3b   : > { %1555 = vmatmul.msk.f32.gmra.mxu0 %vm291_vm1, %v259_v16  ;;  %1558 = vmatmul.msk.f32.gmra.mxu1 %vm291_vm1, %v259_v16 }
  0x3c   : > { %1561 = vmatmul.msk.f32.gmra.mxu2 %vm291_vm1, %v259_v16  ;;  %1564 = vmatmul.msk.f32.gmra.mxu3 %vm291_vm1, %v259_v16 }
  0x88   : > { %v2045_v17 = vpop.permute.xlu0 %269 }
  0x90   : > { %v2047_v18 = vpop.permute.xlu0 %264 }
  0xa0   : > { %v332_v19 = vpop.f32.mrf.mxu0  ;;  %v355_v20 = vpop.f32.mrf.mxu1 }
  0xa1   : > { %v333_v21 = vadd.f32 %v332_v19, %v2047_v18  ;;  %v356_v22 = vadd.f32 %v355_v20, %v2047_v18 }
  0xa3   : > { %v1565_v23 = vmul.f32 -1.442695, %v333_v21  ;;  %v1566_v24 = vmul.f32 -1.442695, %v356_v22 }
  0xa5   : > { %1678 = vpow2.f32 %v1565_v23 }
  0xa6   : > { %1680 = vpow2.f32 %v1566_v24 }
  0xa7   : > { %v378_v25 = vpop.f32.mrf.mxu2  ;;  %v401_v26 = vpop.f32.mrf.mxu3 }
  0xa8   : > { %v379_v27 = vadd.f32 %v378_v25, %v2047_v18  ;;  %v402_v28 = vadd.f32 %v401_v26, %v2047_v18  ;;  %v335_v29 = vpop.f32.mrf.mxu0  ;;  %v358_v30 = vpop.f32.mrf.mxu1 }
  0xa9   : > { %v336_v31 = vadd.f32 %v335_v29, %v2045_v17  ;;  %v359_v32 = vadd.f32 %v358_v30, %v2045_v17 }
  0xaa   : > { %v1567_v33 = vmul.f32 -1.442695, %v379_v27  ;;  %v1568_v34 = vmul.f32 -1.442695, %v402_v28 }
  0xab   : > { %v1679_v35 = vpop.eup %1678  ;;  %v1573_v38 = vmul.f32 -1.442695, %v336_v31  ;;  %v1574_v40 = vmul.f32 -1.442695, %v359_v32 }
  0xac   : > { %v1681_v36 = vpop.eup %1680  ;;  %v2055_v37 = vadd.f32 1.0, %v1679_v35  ;;  %1682 = vpow2.f32 %v1567_v33 }
  0xad   : > { %v2057_v39 = vadd.f32 1.0, %v1681_v36  ;;  %1684 = vpow2.f32 %v1568_v34 }
  0xae   : > { %1686 = vrcp.f32 %v2055_v37  ;;  %v572_v59 = vand.u32 2147483647, %v2055_v37  ;;  %v574_v60 = vand.u32 2147483648, %v2055_v37  ;;  %vm568_vm2 = vweird.f32 %v2055_v37 }
  0xaf   : > { %1688 = vrcp.f32 %v2057_v39  ;;  %v381_v41 = vpop.f32.mrf.mxu2  ;;  %v404_v42 = vpop.f32.mrf.mxu3  ;;  %vm583_vm3 = vweird.f32 %v2057_v39  ;;  %v587_v2 = vand.u32 2147483647, %v2057_v39  ;;  %v589_v3 = vand.u32 2147483648, %v2057_v39 }
  0xb0   : > { %1690 = vpow2.f32 %v1573_v38  ;;  %v382_v43 = vadd.f32 %v381_v41, %v2045_v17  ;;  %v405_v45 = vadd.f32 %v404_v42, %v2045_v17  ;;  %v424_v53 = vpop.f32.mrf.mxu0  ;;  %v447_v63 = vpop.f32.mrf.mxu1  ;;  %vm2091_vm4 = vcmp.eq.f32.partialorder %v572_v59, 8.507059e+37 }
  0xb1   : > { %1692 = vpow2.f32 %v1574_v40  ;;  %v425_v62 = vadd.f32 %v424_v53, %v2047_v18  ;;  %v448_v7 = vadd.f32 %v447_v63, %v2047_v18  ;;  %v575_v8 = vor.u32 1.1754944e-38, %v574_v60 }
  0xb2   : > { %v1683_v44 = vpop.eup %1682  ;;  %v1575_v50 = vmul.f32 -1.442695, %v382_v43  ;;  %v1576_v56 = vmul.f32 -1.442695, %v405_v45  ;;  %vm2111_vm7 = vcmp.eq.f32.partialorder %v587_v2, 8.507059e+37  ;;  %v590_v23 = vor.u32 1.1754944e-38, %v589_v3 }
  0xb3   : > { %v1685_v46 = vpop.eup %1684  ;;  %v2063_v47 = vadd.f32 1.0, %v1683_v44  ;;  %v1569_v11 = vmul.f32 -1.442695, %v425_v62  ;;  %v1570_v24 = vmul.f32 -1.442695, %v448_v7 }
  0xb4   : > { %v2065_v48 = vpop.eup %1686  ;;  %v2067_v49 = vadd.f32 1.0, %v1685_v46 }
  0xb5   : > { %v2069_v51 = vpop.eup %1688  ;;  %v564_v52 = vmul.f32 %v2065_v48, %v2055_v37  ;;  %1694 = vrcp.f32 %v2063_v47  ;;  %vm569_vm5 = vweird.f32 %v2065_v48  ;;  %v604_v13 = vand.u32 2147483648, %v2063_v47 }
  0xb6   : > { %v1691_v54 = vpop.eup %1690  ;;  %v579_v55 = vmul.f32 %v2069_v51, %v2057_v39  ;;  %1696 = vrcp.f32 %v2067_v49  ;;  %vm584_vm6 = vweird.f32 %v2069_v51  ;;  %v602_v16 = vand.u32 2147483647, %v2063_v47  ;;  %vm2117_vm8 = vmor %vm568_vm2, %vm569_vm5 }
  0xb7   : > { %v1693_v57 = vpop.eup %1692  ;;  %v565_v58 = vsub.f32 1.0, %v564_v52  ;;  %1698 = vpow2.f32 %v1575_v50  ;;  %v2081_v0 = vadd.f32 1.0, %v1691_v54  ;;  %v619_v20 = vand.u32 2147483648, %v2067_v49  ;;  %vm2130_vm10 = vmor %vm583_vm3, %vm584_vm6  ;;  %v470_v39 = vpop.f32.mrf.mxu2 }
  0xb8   : > { %v580_v61 = vsub.f32 1.0, %v579_v55  ;;  %v2083_v1 = vadd.f32 1.0, %v1693_v57  ;;  %1700 = vpow2.f32 %v1576_v56  ;;  %vm598_vm9 = vweird.f32 %v2063_v47 }
  0xb9   : > { %v566_v5 = vmul.f32 %v2065_v48, %v565_v58  ;;  %1702 = vrcp.f32 %v2081_v0  ;;  %v605_v32 = vor.u32 1.1754944e-38, %v604_v13  ;;  %vm613_vm11 = vweird.f32 %v2067_v49 }
  0xba   : > { %v581_v9 = vmul.f32 %v2069_v51, %v580_v61  ;;  %1704 = vrcp.f32 %v2083_v1  ;;  %v617_v33 = vand.u32 2147483647, %v2067_v49  ;;  %vm2139_vm13 = vcmp.eq.f32.partialorder %v602_v16, 8.507059e+37 }
  0xbb   : > { %v2088_v4 = vpop.eup %1694  ;;  %v567_v21 = vadd.f32 %v2065_v48, %v566_v5  ;;  %1706 = vpow2.f32 %v1569_v11  ;;  %v620_v36 = vor.u32 1.1754944e-38, %v619_v20  ;;  %v692_v38 = vand.u32 2147483647, %v2081_v0 }
  0xbc   : > { %v594_v10 = vmul.f32 %v2088_v4, %v2063_v47  ;;  %v2100_v12 = vpop.eup %1696  ;;  %v582_v27 = vadd.f32 %v2069_v51, %v581_v9  ;;  %vm599_vm12 = vweird.f32 %v2088_v4  ;;  %vm2161_vm14 = vcmp.eq.f32.partialorder %v617_v33, 8.507059e+37 }
  0xbd   : > { %v1699_v14 = vpop.eup %1698  ;;  %v609_v19 = vmul.f32 %v2100_v12, %v2067_v49  ;;  %v571_v41 = vsel %vm2117_vm8, %v2065_v48, %v567_v21  ;;  %vm688_vm15 = vweird.f32 %v2081_v0  ;;  %v694_v48 = vand.u32 2147483648, %v2081_v0  ;;  %vm2183_vm2 = vmor %vm598_vm9, %vm599_vm12 }
  0xbe   : > { %v595_v15 = vsub.f32 1.0, %v594_v10  ;;  %v1701_v25 = vpop.eup %1700  ;;  %v2136_v34 = vadd.f32 1.0, %v1699_v14  ;;  %v586_v44 = vsel %vm2130_vm10, %v2069_v51, %v582_v27  ;;  %vm703_vm0 = vweird.f32 %v2083_v1  ;;  %v427_v27 = vpop.f32.mrf.mxu0 }
  0xbf   : > { %v610_v29 = vsub.f32 1.0, %v609_v19  ;;  %v2124_v30 = vpop.eup %1702  ;;  %v2153_v43 = vadd.f32 1.0, %v1701_v25  ;;  %v471_v53 = vadd.f32 %v470_v39, %v2047_v18  ;;  %v576_v51 = vsel %vm2091_vm4, %v575_v8, %v571_v41 }
  0xc0   : > { %v596_v28 = vmul.f32 %v2088_v4, %v595_v15  ;;  %v684_v37 = vmul.f32 %v2124_v30, %v2081_v0  ;;  %v2146_v40 = vpop.eup %1704  ;;  %1708 = vrcp.f32 %v2136_v34  ;;  %vm2172_vm1 = vcmp.eq.f32.partialorder %v692_v38, 8.507059e+37  ;;  %v493_v15 = vpop.f32.mrf.mxu3 }
  0xc1   : > { %v611_v42 = vmul.f32 %v2100_v12, %v610_v29  ;;  %v699_v50 = vmul.f32 %v2146_v40, %v2083_v1  ;;  %v707_v57 = vand.u32 2147483647, %v2083_v1  ;;  %v1707_v58 = vpop.eup %1706  ;;  %v591_v59 = vsel %vm2111_vm7, %v590_v23, %v586_v44  ;;  %v473_v44 = vpop.f32.mrf.mxu2 }
  0xc2   : > { %v597_v45 = vadd.f32 %v2088_v4, %v596_v28  ;;  %v685_v46 = vsub.f32 1.0, %v684_v37  ;;  %vm614_vm3 = vweird.f32 %v2100_v12  ;;  %1710 = vrcp.f32 %v2153_v43 }
  0xc3   : > { %v700_v56 = vsub.f32 1.0, %v699_v50  ;;  %v612_v61 = vadd.f32 %v2100_v12, %v611_v42  ;;  %vm689_vm4 = vweird.f32 %v2124_v30  ;;  %v2198_v3 = vmul.f32 -1.442695, %v576_v51  ;;  %vm2207_vm5 = vmor %vm613_vm11, %vm614_vm3 }
  0xc4   : > { %v686_v54 = vmul.f32 %v2124_v30, %v685_v46  ;;  %v601_v62 = vsel %vm2183_vm2, %v2088_v4, %v597_v45  ;;  %v709_v5 = vand.u32 2147483648, %v2083_v1  ;;  %v2201_v6 = vadd.f32 1.0, %v1707_v58  ;;  %vm2224_vm7 = vmor %vm688_vm15, %vm689_vm4  ;;  %v450_v1 = vpop.f32.mrf.mxu1 }
  0xc5   : > { %v701_v47 = vmul.f32 %v2146_v40, %v700_v56  ;;  %1712 = vpow2.f32 %v1570_v24  ;;  %v2203_v7 = vmul.f32 -1.442695, %v591_v59  ;;  %v695_v8 = vor.u32 1.1754944e-38, %v694_v48 }
  0xc6   : > { %v687_v63 = vadd.f32 %v2124_v30, %v686_v54  ;;  %v2196_v2 = vpop.eup %1708  ;;  %vm2211_vm6 = vcmp.eq.f32.partialorder %v707_v57, 8.507059e+37  ;;  %v606_v11 = vsel %vm2139_vm13, %v605_v32, %v601_v62  ;;  %v616_v13 = vsel %vm2207_vm5, %v2100_v12, %v612_v61 }
  0xc7   : > { %v714_v10 = vmul.f32 %v2196_v2, %v2136_v34  ;;  %v722_v14 = vand.u32 2147483647, %v2136_v34  ;;  %1714 = vrcp.f32 %v2201_v6  ;;  %v702_v19 = vadd.f32 %v2146_v40, %v701_v47 }
  0xc8   : > { %v691_v16 = vsel %vm2224_vm7, %v2124_v30, %v687_v63  ;;  %vm704_vm8 = vweird.f32 %v2146_v40  ;;  %v2235_v20 = vpop.eup %1710  ;;  %v710_v0 = vor.u32 1.1754944e-38, %v709_v5  ;;  %vm718_vm9 = vweird.f32 %v2136_v34  ;;  %v496_v59 = vpop.f32.mrf.mxu3 }
  0xc9   : > { %v715_v12 = vsub.f32 1.0, %v714_v10  ;;  %v724_v21 = vand.u32 2147483648, %v2136_v34  ;;  %v1571_v22 = vmul.f32 -1.442695, %v471_v53  ;;  %v2239_v23 = vmul.f32 -1.442695, %v606_v11  ;;  %vm2250_vm10 = vmor %vm703_vm0, %vm704_vm8 }
  0xca   : > { %v621_v24 = vsel %vm2161_vm14, %v620_v36, %v616_v13  ;;  %v729_v26 = vmul.f32 %v2235_v20, %v2153_v43  ;;  %v696_v29 = vsel %vm2172_vm1, %v695_v8, %v691_v16  ;;  %vm719_vm11 = vweird.f32 %v2196_v2 }
  0xcb   : > { %v716_v25 = vmul.f32 %v2196_v2, %v715_v12  ;;  %v1713_v28 = vpop.eup %1712  ;;  %vm2255_vm12 = vcmp.eq.f32.partialorder %v722_v14, 8.507059e+37  ;;  %1716 = vpow2.f32 %v1571_v22  ;;  %v706_v32 = vsel %vm2250_vm10, %v2146_v40, %v702_v19  ;;  %vm2280_vm13 = vmor %vm718_vm9, %vm719_vm11 }
  0xcc   : > { %v730_v35 = vsub.f32 1.0, %v729_v26  ;;  %v2263_v36 = vadd.f32 1.0, %v1713_v28  ;;  %v725_v38 = vor.u32 1.1754944e-38, %v724_v21  ;;  %v739_v39 = vand.u32 2147483648, %v2153_v43 }
  0xcd   : > { %v717_v33 = vadd.f32 %v2196_v2, %v716_v25  ;;  %v2265_v37 = vpop.eup %1714  ;;  %v494_v41 = vadd.f32 %v493_v15, %v2047_v18  ;;  %v428_v42 = vadd.f32 %v427_v27, %v2045_v17  ;;  %v1589_v45 = vmul.f32 -1.442695, %v696_v29 }
  0xce   : > { %v731_v46 = vmul.f32 %v2235_v20, %v730_v35  ;;  %v737_v40 = vand.u32 2147483647, %v2153_v43  ;;  %v624_v50 = vmul.f32 %v2265_v37, %v2201_v6  ;;  %v711_v52 = vsel %vm2211_vm6, %v710_v0, %v706_v32 }
  0xcf   : > { %vm734_vm14 = vweird.f32 %v2235_v20  ;;  %1718 = vrcp.f32 %v2263_v36  ;;  %v451_v48 = vadd.f32 %v450_v1, %v2045_v17  ;;  %v721_v53 = vsel %vm2280_vm13, %v2196_v2, %v717_v33 }
  0xd0   : > { %v732_v51 = vadd.f32 %v2235_v20, %v731_v46  ;;  %v625_v54 = vsub.f32 1.0, %v624_v50  ;;  %v474_v55 = vadd.f32 %v473_v44, %v2045_v17  ;;  %vm733_vm15 = vweird.f32 %v2153_v43 }
  0xd1   : > { %v1717_v34 = vpop.eup %1716  ;;  %v740_v56 = vor.u32 1.1754944e-38, %v739_v39  ;;  %v1572_v57 = vmul.f32 -1.442695, %v494_v41  ;;  %v1577_v58 = vmul.f32 -1.442695, %v428_v42  ;;  %1720 = vpow2.f32 %v1589_v45  ;;  %vm2299_vm0 = vmor %vm733_vm15, %vm734_vm14 }
  0xd2   : > { %v1590_v60 = vmul.f32 -1.442695, %v711_v52  ;;  %v626_v61 = vmul.f32 %v2265_v37, %v625_v54  ;;  %v632_v62 = vand.u32 2147483647, %v2201_v6  ;;  %v726_v63 = vsel %vm2255_vm12, %v725_v38, %v721_v53 }
  0xd3   : > { %v2303_v43 = vadd.f32 1.0, %v1717_v34  ;;  %1722 = vpow2.f32 %v1572_v57  ;;  %v1578_v2 = vmul.f32 -1.442695, %v451_v48  ;;  %v736_v5 = vsel %vm2299_vm0, %v2235_v20, %v732_v51 }
  0xd4   : > { %1724 = vpow2.f32 %v1577_v58  ;;  %v1579_v4 = vmul.f32 -1.442695, %v474_v55  ;;  %v497_v8 = vadd.f32 %v496_v59, %v2045_v17  ;;  %v627_v10 = vadd.f32 %v2265_v37, %v626_v61 }
  0xd5   : > { %v2309_v9 = vpop.eup %1718  ;;  %vm629_vm1 = vweird.f32 %v2265_v37  ;;  %v634_v11 = vand.u32 2147483648, %v2201_v6  ;;  %1726 = vrcp.f32 %v2303_v43  ;;  %v2315_v13 = vmul.f32 -1.442695, %v621_v24 }
  0xd6   : > { %1728 = vpow2.f32 %v1590_v60  ;;  %vm738_vm2 = vcmp.eq.f32.partialorder %v737_v40, 8.507059e+37  ;;  %v639_v49 = vmul.f32 %v2309_v9, %v2263_v36  ;;  %v1591_v14 = vmul.f32 -1.442695, %v726_v63 }
  0xd7   : > { %v741_v15 = vsel %vm738_vm2, %v740_v56, %v736_v5  ;;  %vm628_vm3 = vweird.f32 %v2201_v6  ;;  %1730 = vpow2.f32 %v1578_v2  ;;  %v1721_v17 = vpop.eup %1720  ;;  %vm2324_vm5 = vcmp.eq.f32.partialorder %v632_v62, 8.507059e+37 }
  0xd8   : > { %vm2320_vm4 = vmor %vm628_vm3, %vm629_vm1  ;;  %v640_v12 = vsub.f32 1.0, %v639_v49  ;;  %1732 = vpow2.f32 %v1579_v4  ;;  %v1580_v20 = vmul.f32 -1.442695, %v497_v8  ;;  %v635_v22 = vor.u32 1.1754944e-38, %v634_v11 }
  0xd9   : > { %v1723_v0 = vpop.eup %1722  ;;  %v631_v21 = vsel %vm2320_vm4, %v2265_v37, %v627_v10  ;;  %v647_v6 = vand.u32 2147483647, %v2263_v36  ;;  %v649_v24 = vand.u32 2147483648, %v2263_v36  ;;  %v1592_v26 = vmul.f32 -1.442695, %v741_v15 }
  0xda   : > { %v1725_v25 = vpop.eup %1724  ;;  %v641_v27 = vmul.f32 %v2309_v9, %v640_v12  ;;  %v2334_v28 = vadd.f32 1.0, %v1723_v0  ;;  %1734 = vpow2.f32 %v1580_v20  ;;  %v662_v30 = vand.u32 2147483647, %v2303_v43 }
  0xdb   : > { %v2336_v29 = vpop.eup %1726  ;;  %1736 = vpow2.f32 %v1591_v14  ;;  %v664_v31 = vand.u32 2147483648, %v2303_v43  ;;  %v2340_v32 = vadd.f32 1.0, %v1725_v25  ;;  %v636_v35 = vsel %vm2324_vm5, %v635_v22, %v631_v21 }
  0xdc   : > { %v1729_v33 = vpop.eup %1728  ;;  %v654_v1 = vmul.f32 %v2336_v29, %v2303_v43  ;;  %1738 = vrcp.f32 %v2334_v28  ;;  %v2347_v37 = vadd.f32 1.0, %v1721_v17  ;;  %v642_v39 = vadd.f32 %v2309_v9, %v641_v27 }
  0xdd   : > { %v1731_v38 = vpop.eup %1730  ;;  %vm643_vm6 = vweird.f32 %v2263_v36  ;;  %vm644_vm7 = vweird.f32 %v2309_v9  ;;  %1740 = vrcp.f32 %v2340_v32  ;;  %vm2353_vm8 = vcmp.eq.f32.partialorder %v647_v6, 8.507059e+37 }
  0xde   : > { %v1733_v41 = vpop.eup %1732  ;;  %1742 = vpow2.f32 %v1592_v26  ;;  %v650_v44 = vor.u32 1.1754944e-38, %v649_v24  ;;  %v655_v45 = vsub.f32 1.0, %v654_v1  ;;  %v2357_v46 = vmul.f32 -1.442695, %v636_v35  ;;  %vm2361_vm10 = vmor %vm643_vm6, %vm644_vm7 }
  0xdf   : > { %vm658_vm9 = vweird.f32 %v2303_v43  ;;  %v665_v40 = vor.u32 1.1754944e-38, %v664_v31  ;;  %1744 = vpow2.f32 %v2198_v3  ;;  %vm2366_vm11 = vcmp.eq.f32.partialorder %v662_v30, 8.507059e+37 }
  0xe0   : > { %v1735_v36 = vpop.eup %1734  ;;  %v656_v52 = vmul.f32 %v2336_v29, %v655_v45  ;;  %v2370_v48 = vadd.f32 1.0, %v1731_v38  ;;  %1746 = vrcp.f32 %v2347_v37  ;;  %v2373_v53 = vadd.f32 1.0, %v1729_v33 }
  0xe1   : > { %v2375_v51 = vpop.eup %1736  ;;  %v646_v3 = vsel %vm2361_vm10, %v2309_v9, %v642_v39  ;;  %vm659_vm12 = vweird.f32 %v2336_v29  ;;  %v679_v54 = vand.u32 2147483648, %v2334_v28  ;;  %v2382_v55 = vadd.f32 1.0, %v1733_v41 }
  0xe2   : > { %v2384_v34 = vpop.eup %1738  ;;  %v657_v56 = vadd.f32 %v2336_v29, %v656_v52  ;;  %v752_v57 = vand.u32 2147483647, %v2340_v32  ;;  %v754_v58 = vand.u32 2147483648, %v2340_v32  ;;  %1748 = vrcp.f32 %v2370_v48  ;;  %vm2411_vm14 = vmor %vm658_vm9, %vm659_vm12 }
  0xe3   : > { %v1741_v59 = vpop.eup %1740  ;;  %v669_v60 = vmul.f32 %v2384_v34, %v2334_v28  ;;  %1750 = vrcp.f32 %v2382_v55  ;;  %v2393_v61 = vadd.f32 1.0, %v1735_v36  ;;  %v996_v62 = vand.u32 2147483647, %v2347_v37 }
  0xe4   : > { %v2396_v63 = vpop.eup %1742  ;;  %v2400_v47 = vsel %vm2353_vm8, %v650_v44, %v646_v3  ;;  %v677_v2 = vand.u32 2147483647, %v2334_v28  ;;  %v744_v5 = vmul.f32 %v1741_v59, %v2340_v32  ;;  %vm748_vm13 = vweird.f32 %v2340_v32 }
  0xe5   : > { %v2405_v4 = vpop.eup %1744  ;;  %v670_v9 = vsub.f32 1.0, %v669_v60  ;;  %v2415_v10 = vor.u32 1.1754944e-38, %v679_v54  ;;  %v767_v11 = vand.u32 2147483647, %v2370_v48  ;;  %v769_v49 = vand.u32 2147483648, %v2370_v48 }
  0xe6   : > { %v2419_v14 = vpop.eup %1746  ;;  %v661_v15 = vsel %vm2411_vm14, %v2336_v29, %v657_v56  ;;  %vm673_vm15 = vweird.f32 %v2334_v28  ;;  %v745_v43 = vsub.f32 1.0, %v744_v5  ;;  %vm2425_vm0 = vcmp.eq.f32.partialorder %v752_v57, 8.507059e+37 }
  0xe7   : > { %v755_v16 = vor.u32 1.1754944e-38, %v754_v58  ;;  %vm763_vm1 = vweird.f32 %v2370_v48  ;;  %v782_v19 = vand.u32 2147483647, %v2382_v55  ;;  %v784_v12 = vand.u32 2147483648, %v2382_v55 }
  0xe8   : > { %1752 = vrcp.f32 %v2393_v61  ;;  %v1749_v20 = vpop.eup %1748  ;;  %v671_v0 = vmul.f32 %v2384_v34, %v670_v9  ;;  %vm674_vm2 = vweird.f32 %v2384_v34  ;;  %v746_v21 = vmul.f32 %v1741_v59, %v745_v43 }
  0xe9   : > { %vm749_vm3 = vweird.f32 %v1741_v59  ;;  %v1751_v22 = vpop.eup %1750  ;;  %v666_v6 = vsel %vm2366_vm11, %v665_v40, %v661_v15  ;;  %v759_v24 = vmul.f32 %v1749_v20, %v2370_v48  ;;  %vm2438_vm4 = vcmp.eq.f32.partialorder %v767_v11, 8.507059e+37 }
  0xea   : > { %v770_v26 = vor.u32 1.1754944e-38, %v769_v49  ;;  %vm992_vm5 = vweird.f32 %v2347_v37  ;;  %v747_v27 = vadd.f32 %v1741_v59, %v746_v21  ;;  %v774_v29 = vmul.f32 %v1751_v22, %v2382_v55  ;;  %vm750_vm8 = vmor %vm748_vm13, %vm749_vm3 }
  0xeb   : > { %vm778_vm6 = vweird.f32 %v2382_v55  ;;  %v797_v30 = vand.u32 2147483647, %v2393_v61  ;;  %vm2446_vm7 = vcmp.eq.f32.partialorder %v677_v2, 8.507059e+37  ;;  %v760_v33 = vsub.f32 1.0, %v759_v24  ;;  %vm2471_vm13 = vmor %vm673_vm15, %vm674_vm2 }
  0xec   : > { %vm2452_vm9 = vcmp.eq.f32.partialorder %v782_v19, 8.507059e+37  ;;  %v785_v1 = vor.u32 1.1754944e-38, %v784_v12  ;;  %v988_v38 = vmul.f32 %v2419_v14, %v2347_v37  ;;  %vm2458_vm10 = vcmp.eq.f32.partialorder %v996_v62, 8.507059e+37 }
  0xed   : > { %v672_v41 = vadd.f32 %v2384_v34, %v671_v0  ;;  %v751_v42 = vsel %vm750_vm8, %v1741_v59, %v747_v27  ;;  %vm764_vm11 = vweird.f32 %v1749_v20  ;;  %v775_v44 = vsub.f32 1.0, %v774_v29 }
  0xee   : > { %v1753_v32 = vpop.eup %1752  ;;  %v756_v45 = vsel %vm2425_vm0, %v755_v16, %v751_v42  ;;  %v761_v40 = vmul.f32 %v1749_v20, %v760_v33  ;;  %v989_v36 = vsub.f32 1.0, %v988_v38  ;;  %v998_v50 = vand.u32 2147483648, %v2347_v37  ;;  %vm765_vm0 = vmor %vm763_vm1, %vm764_vm11 }
  0xef   : > { %v1593_v52 = vmul.f32 -1.442695, %v756_v45  ;;  %v776_v18 = vmul.f32 %v1751_v22, %v775_v44  ;;  %vm779_vm12 = vweird.f32 %v1751_v22  ;;  %v789_v3 = vmul.f32 %v1753_v32, %v2393_v61 }
  0xf0   : > { %v762_v56 = vadd.f32 %v1749_v20, %v761_v40  ;;  %v990_v57 = vmul.f32 %v2419_v14, %v989_v36  ;;  %vm993_vm14 = vweird.f32 %v2419_v14  ;;  %1754 = vrcp.f32 %v2373_v53  ;;  %vm780_vm15 = vmor %vm778_vm6, %vm779_vm12 }
  0xf1   : > { %v676_v58 = vsel %vm2471_vm13, %v2384_v34, %v672_v41  ;;  %v777_v28 = vadd.f32 %v1751_v22, %v776_v18  ;;  %v790_v59 = vsub.f32 1.0, %v789_v3  ;;  %v799_v60 = vand.u32 2147483648, %v2393_v61  ;;  %vm994_vm1 = vmor %vm992_vm5, %vm993_vm14 }
  0xf2   : > { %v766_v62 = vsel %vm765_vm0, %v1749_v20, %v762_v56  ;;  %vm794_vm2 = vweird.f32 %v1753_v32  ;;  %v991_v2 = vadd.f32 %v2419_v14, %v990_v57  ;;  %v999_v5 = vor.u32 1.1754944e-38, %v998_v50 }
  0xf3   : > { %1756 = vpow2.f32 %v1593_v52  ;;  %v771_v34 = vsel %vm2438_vm4, %v770_v26, %v766_v62  ;;  %v781_v8 = vsel %vm780_vm15, %v1751_v22, %v777_v28  ;;  %v791_v9 = vmul.f32 %v1753_v32, %v790_v59 }
  0xf4   : > { %v1594_v48 = vmul.f32 -1.442695, %v771_v34  ;;  %v786_v55 = vsel %vm2452_vm9, %v785_v1, %v781_v8  ;;  %v995_v11 = vsel %vm994_vm1, %v2419_v14, %v991_v2  ;;  %v2498_v49 = vadd.f32 1.0, %v2405_v4 }
  0xf5   : > { %v681_v15 = vsel %vm2446_vm7, %v2415_v10, %v676_v58  ;;  %v792_v43 = vadd.f32 %v1753_v32, %v791_v9  ;;  %vm793_vm3 = vweird.f32 %v2393_v61  ;;  %v1000_v37 = vsel %vm2458_vm10, %v999_v5, %v995_v11 }
  0xf6   : > { %v1755_v17 = vpop.eup %1754  ;;  %v2507_v16 = vmul.f32 -1.442695, %v2400_v47  ;;  %v2509_v19 = vmul.f32 -1.442695, %v666_v6  ;;  %vm2512_vm4 = vmor %vm793_vm3, %vm794_vm2  ;;  %vm798_vm5 = vcmp.eq.f32.partialorder %v797_v30, 8.507059e+37  ;;  %1132 = vmatpush.msra.mxu0 %v1000_v37  ;;  %1758 = vpow2.f32 %v1594_v48 }
  0xf7   : > { %v1595_v10 = vmul.f32 -1.442695, %v786_v55  ;;  %v796_v61 = vsel %vm2512_vm4, %v1753_v32, %v792_v43  ;;  %v1003_v14 = vmul.f32 %v1755_v17, %v2373_v53  ;;  %v2519_v12 = vmul.f32 -1.442695, %v681_v15 }
  0xf8   : > { %v800_v47 = vor.u32 1.1754944e-38, %v799_v60  ;;  %v1011_v20 = vand.u32 2147483647, %v2373_v53  ;;  %1760 = vrcp.f32 %v2498_v49  ;;  %v1013_v22 = vand.u32 2147483648, %v2373_v53 }
  0xf9   : > { %v1757_v0 = vpop.eup %1756  ;;  %v1004_v21 = vsub.f32 1.0, %v1003_v14  ;;  %1762 = vpow2.f32 %v2203_v7  ;;  %v2526_v6 = vadd.f32 1.0, %v2375_v51  ;;  %v878_v25 = vand.u32 2147483648, %v2498_v49 }
  0xfa   : > { %v801_v24 = vsel %vm798_vm5, %v800_v47, %v796_v61  ;;  %v2530_v26 = vadd.f32 1.0, %v2396_v63  ;;  %1764 = vpow2.f32 %v2239_v23  ;;  %vm1008_vm6 = vweird.f32 %v1755_v17 }
  0xfb   : > { %1766 = vpow2.f32 %v1595_v10  ;;  %v1005_v27 = vmul.f32 %v1755_v17, %v1004_v21  ;;  %v876_v29 = vand.u32 2147483647, %v2498_v49  ;;  %vm1007_vm7 = vweird.f32 %v2373_v53  ;;  %v2596_v10 = vld [vmem:[%s2819_s3] sm:$0xff] }
  0xfc   : > { %vm2535_vm8 = vcmp.eq.f32.partialorder %v1011_v20, 8.507059e+37  ;;  %1768 = vrcp.f32 %v2526_v6  ;;  %v2540_v51 = vadd.f32 1.0, %v1757_v0  ;;  %v1759_v30 = vpop.eup %1758  ;;  %v1596_v63 = vmul.f32 -1.442695, %v801_v24  ;;  %vm1009_vm9 = vmor %vm1007_vm7, %vm1008_vm6 }
  0xfd   : > { %v1006_v31 = vadd.f32 %v1755_v17, %v1005_v27  ;;  %v1014_v33 = vor.u32 1.1754944e-38, %v1013_v22  ;;  %1770 = vrcp.f32 %v2530_v26  ;;  %vm872_vm10 = vweird.f32 %v2498_v49 }
  0xfe   : > { %v1761_v23 = vpop.eup %1760  ;;  %v879_v35 = vor.u32 1.1754944e-38, %v878_v25  ;;  %v1028_v53 = vand.u32 2147483648, %v2526_v6  ;;  %1772 = vpow2.f32 %v2315_v13  ;;  %vm2547_vm11 = vcmp.eq.f32.partialorder %v876_v29, 8.507059e+37 }
  0xff   : > { %v1763_v1 = vpop.eup %1762  ;;  %v1010_v38 = vsel %vm1009_vm9, %v1755_v17, %v1006_v31  ;;  %v868_v39 = vmul.f32 %v1761_v23, %v2498_v49  ;;  %v1026_v42 = vand.u32 2147483647, %v2526_v6  ;;  %v1041_v44 = vand.u32 2147483647, %v2530_v26 }
 0x100   : > { %v1765_v32 = vpop.eup %1764  ;;  %v1015_v45 = vsel %vm2535_vm8, %v1014_v33, %v1010_v38  ;;  %v2555_v40 = vadd.f32 1.0, %v1763_v1  ;;  %v1043_v13 = vand.u32 2147483648, %v2530_v26  ;;  %1774 = vrcp.f32 %v2540_v51 }
 0x101   : > { %v2559_v36 = vpop.eup %1766  ;;  %1776 = vpow2.f32 %v1596_v63  ;;  %1152 = vmatpush.msra.mxu1 %v1015_v45  ;;  %v869_v50 = vsub.f32 1.0, %v868_v39  ;;  %v2561_v52 = vadd.f32 1.0, %v1765_v32  ;;  %vm1114_vm12 = vcmask 130048  }
 0x102   : > { %v1769_v18 = vpop.eup %1768  ;;  %1778 = vrcp.f32 %v2555_v40  ;;  %vm1022_vm13 = vweird.f32 %v2526_v6  ;;  %v1029_v3 = vor.u32 1.1754944e-38, %v1028_v53  ;;  %vm1037_vm14 = vweird.f32 %v2530_v26 }
 0x103   : > { %v1771_v54 = vpop.eup %1770  ;;  %v870_v56 = vmul.f32 %v1761_v23, %v869_v50  ;;  %vm873_vm0 = vweird.f32 %v1761_v23  ;;  %v1018_v57 = vmul.f32 %v1769_v18, %v2526_v6  ;;  %vm2567_vm15 = vcmp.eq.f32.partialorder %v1026_v42, 8.507059e+37 }
 0x104   : > { %1780 = vrcp.f32 %v2561_v52  ;;  %v1773_v28 = vpop.eup %1772  ;;  %v1033_v59 = vmul.f32 %v1771_v54, %v2530_v26  ;;  %vm2573_vm2 = vcmp.eq.f32.partialorder %v1041_v44, 8.507059e+37  ;;  %v1044_v62 = vor.u32 1.1754944e-38, %v1043_v13  ;;  %vm874_vm1 = vmor %vm872_vm10, %vm873_vm0 }
 0x105   : > { %v1056_v2 = vand.u32 2147483647, %v2540_v51  ;;  %v1058_v5 = vand.u32 2147483648, %v2540_v51  ;;  %v871_v34 = vadd.f32 %v1761_v23, %v870_v56  ;;  %v891_v8 = vand.u32 2147483647, %v2555_v40 }
 0x106   : > { %v893_v9 = vand.u32 2147483648, %v2555_v40  ;;  %v1019_v48 = vsub.f32 1.0, %v1018_v57  ;;  %v2581_v55 = vpop.eup %1774  ;;  %vm887_vm3 = vweird.f32 %v2555_v40  ;;  %v1034_v11 = vsub.f32 1.0, %v1033_v59 }
 0x107   : > { %v2587_v15 = vadd.f32 1.0, %v1773_v28  ;;  %v2589_v43 = vadd.f32 1.0, %v1759_v30  ;;  %v2591_v37 = vpop.eup %1776  ;;  %v875_v17 = vsel %vm874_vm1, %v1761_v23, %v871_v34  ;;  %vm1023_vm4 = vweird.f32 %v1769_v18 }
 0x108   : > { %v1020_v4 = vmul.f32 %v1769_v18, %v1019_v48  ;;  %v1048_v49 = vmul.f32 %v2581_v55, %v2540_v51  ;;  %vm1052_vm5 = vweird.f32 %v2540_v51  ;;  %v1779_v61 = vpop.eup %1778  ;;  %v880_v14 = vsel %vm2547_vm11, %v879_v35, %v875_v17  ;;  %vm1024_vm8 = vmor %vm1022_vm13, %vm1023_vm4 }
 0x109   : > { %v1035_v47 = vmul.f32 %v1771_v54, %v1034_v11  ;;  %vm1038_vm6 = vweird.f32 %v1771_v54  ;;  %1782 = vrcp.f32 %v2587_v15  ;;  %1133 = vmatpush.msra.mxu0 %v880_v14  ;;  %v883_v0 = vmul.f32 %v1779_v61, %v2555_v40 }
 0x10a   : > { %v1781_v20 = vpop.eup %1780  ;;  %vm2605_vm7 = vcmp.eq.f32.partialorder %v891_v8, 8.507059e+37  ;;  %v894_v22 = vor.u32 1.1754944e-38, %v893_v9  ;;  %v1021_v24 = vadd.f32 %v1769_v18, %v1020_v4  ;;  %vm902_vm9 = vweird.f32 %v2561_v52  ;;  %1597 = vmatmul.msk.f32.vlgmr.msra.gmra.mxu0 %vm1114_vm12, %v2596_v10  ;;  %vm1039_vm10 = vmor %vm1037_vm14, %vm1038_vm6 }
 0x10b   : > { %v1036_v25 = vadd.f32 %v1771_v54, %v1035_v47  ;;  %v898_v27 = vmul.f32 %v1781_v20, %v2561_v52  ;;  %v906_v29 = vand.u32 2147483647, %v2561_v52  ;;  %v884_v7 = vsub.f32 1.0, %v883_v0 }
 0x10c   : > { %v1025_v30 = vsel %vm1024_vm8, %v1769_v18, %v1021_v24  ;;  %v908_v63 = vand.u32 2147483648, %v2561_v52  ;;  %v1049_v6 = vsub.f32 1.0, %v1048_v49  ;;  %vm888_vm11 = vweird.f32 %v1779_v61 }
 0x10d   : > { %v1030_v31 = vsel %vm2567_vm15, %v1029_v3, %v1025_v30  ;;  %v1040_v33 = vsel %vm1039_vm10, %v1771_v54, %v1036_v25  ;;  %v899_v23 = vsub.f32 1.0, %v898_v27  ;;  %v885_v35 = vmul.f32 %v1779_v61, %v884_v7  ;;  %vm889_vm15 = vmor %vm887_vm3, %vm888_vm11 }
 0x10e   : > { %1172 = vmatpush.msra.mxu2 %v1030_v31  ;;  %v1045_v53 = vsel %vm2573_vm2, %v1044_v62, %v1040_v33  ;;  %v1050_v1 = vmul.f32 %v2581_v55, %v1049_v6  ;;  %vm2626_vm13 = vcmp.eq.f32.partialorder %v1056_v2, 8.507059e+37  ;;  %vm903_vm14 = vweird.f32 %v1781_v20  ;;  %v1108_v62 = vld [vmem:[%s2820_s4] sm:$0xff] }
 0x10f   : > { %v1783_v26 = vpop.eup %1782  ;;  %1192 = vmatpush.msra.mxu3 %v1045_v53  ;;  %v900_v39 = vmul.f32 %v1781_v20, %v899_v23  ;;  %vm1053_vm0 = vweird.f32 %v2581_v55  ;;  %1784 = vrcp.f32 %v2589_v43  ;;  %v886_v41 = vadd.f32 %v1779_v61, %v885_v35  ;;  %vm904_vm3 = vmor %vm902_vm9, %vm903_vm14  ;;  %1111 = vperm.xlu1 %1677, %v1108_v62  }
 0x110   : > { %vm2635_vm2 = vcmp.eq.f32.partialorder %v906_v29, 8.507059e+37  ;;  %v913_v44 = vmul.f32 %v1783_v26, %v2587_v15  ;;  %v1051_v32 = vadd.f32 %v2581_v55, %v1050_v1  ;;  %v909_v13 = vor.u32 1.1754944e-38, %v908_v63  ;;  %vm1054_vm1 = vmor %vm1052_vm5, %vm1053_vm0 }
 0x111   : > { %v901_v45 = vadd.f32 %v1781_v20, %v900_v39  ;;  %v921_v50 = vand.u32 2147483647, %v2587_v15  ;;  %v1059_v18 = vor.u32 1.1754944e-38, %v1058_v5  ;;  %v890_v40 = vsel %vm889_vm15, %v1779_v61, %v886_v41 }
 0x112   : > { %v914_v3 = vsub.f32 1.0, %v913_v44  ;;  %v1055_v54 = vsel %vm1054_vm1, %v2581_v55, %v1051_v32  ;;  %1786 = vpow2.f32 %v2357_v46  ;;  %v895_v56 = vsel %vm2605_vm7, %v894_v22, %v890_v40 }
 0x113   : > { %v905_v57 = vsel %vm904_vm3, %v1781_v20, %v901_v45  ;;  %v923_v58 = vand.u32 2147483648, %v2587_v15  ;;  %v1060_v28 = vsel %vm2626_vm13, %v1059_v18, %v1055_v54  ;;  %1153 = vmatpush.msra.mxu1 %v895_v56  ;;  %vm918_vm4 = vweird.f32 %v1783_v26 }
 0x114   : > { %v910_v51 = vsel %vm2635_vm2, %v909_v13, %v905_v57  ;;  %v915_v52 = vmul.f32 %v1783_v26, %v914_v3  ;;  %1212 = vmatpush.msrb.mxu0 %v1060_v28  ;;  %1788 = vpow2.f32 %v2507_v16  ;;  %1598 = vmatmul.msk.f32.vlgmr.msra.gmra.mxu1 %vm1114_vm12, %v2596_v10  ;;  %v2661_v46 = vadd.f32 1.0, %v2559_v36 }
 0x115   : > { %v1785_v59 = vpop.eup %1784  ;;  %1173 = vmatpush.msra.mxu2 %v910_v51  ;;  %v2664_v60 = vadd.f32 1.0, %v2591_v37  ;;  %1790 = vpow2.f32 %v2509_v19  ;;  %vm917_vm5 = vweird.f32 %v2587_v15  ;;  %v924_v36 = vor.u32 1.1754944e-38, %v923_v58 }
 0x116   : > { %v916_v2 = vadd.f32 %v1783_v26, %v915_v52  ;;  %1599 = vmatmul.msk.f32.vlgmr.msra.gmra.mxu2 %vm1114_vm12, %v2596_v10  ;;  %v1063_v16 = vmul.f32 %v1785_v59, %v2589_v43  ;;  %1792 = vpow2.f32 %v2519_v12  ;;  %vm919_vm6 = vmor %vm917_vm5, %vm918_vm4  ;;  %vm922_vm7 = vcmp.eq.f32.partialorder %v921_v50, 8.507059e+37 }
 0x117   : > { %1794 = vrcp.f32 %v2661_v46  ;;  %v1071_v9 = vand.u32 2147483647, %v2589_v43  ;;  %v1073_v48 = vand.u32 2147483648, %v2589_v43  ;;  %vm1068_vm8 = vweird.f32 %v1785_v59 }
 0x118   : > { %v1787_v19 = vpop.eup %1786  ;;  %v920_v5 = vsel %vm919_vm6, %v1783_v26, %v916_v2  ;;  %v1064_v34 = vsub.f32 1.0, %v1063_v16  ;;  %1796 = vrcp.f32 %v2664_v60  ;;  %vm1067_vm9 = vweird.f32 %v2589_v43 }
 0x119   : > { %v925_v8 = vsel %vm922_vm7, %v924_v36, %v920_v5  ;;  %v2680_v55 = vadd.f32 1.0, %v1787_v19  ;;  %vm1069_vm10 = vmor %vm1067_vm9, %vm1068_vm8  ;;  %vm1072_vm11 = vcmp.eq.f32.partialorder %v1071_v9, 8.507059e+37  ;;  %v1074_v61 = vor.u32 1.1754944e-38, %v1073_v48 }
 0x11a   : > { %v1789_v12 = vpop.eup %1788  ;;  %1193 = vmatpush.msra.mxu3 %v925_v8  ;;  %v1065_v11 = vmul.f32 %v1785_v59, %v1064_v34  ;;  %v1086_v14 = vand.u32 2147483647, %v2661_v46  ;;  %vm1082_vm13 = vweird.f32 %v2661_v46  ;;  %v1088_v21 = vand.u32 2147483648, %v2661_v46 }
 0x11b   : > { %v1791_v15 = vpop.eup %1790  ;;  %1600 = vmatmul.msk.f32.vlgmr.msra.gmra.mxu3 %vm1114_vm12, %v2596_v10  ;;  %1798 = vrcp.f32 %v2680_v55  ;;  %v2686_v4 = vadd.f32 1.0, %v1789_v12  ;;  %v1101_v24 = vand.u32 2147483647, %v2664_v60  ;;  %vm1097_vm14 = vweird.f32 %v2664_v60 }
 0x11c   : > { %v1793_v37 = vpop.eup %1792  ;;  %v1066_v17 = vadd.f32 %v1785_v59, %v1065_v11  ;;  %v2689_v47 = vadd.f32 1.0, %v1791_v15  ;;  %v1103_v29 = vand.u32 2147483648, %v2664_v60  ;;  %v936_v30 = vand.u32 2147483647, %v2680_v55 }
 0x11d   : > { %v1795_v49 = vpop.eup %1794  ;;  %1800 = vrcp.f32 %v2686_v4  ;;  %v2696_v25 = vadd.f32 1.0, %v1793_v37  ;;  %v938_v63 = vand.u32 2147483648, %v2680_v55  ;;  %vm2704_vm0 = vcmp.eq.f32.partialorder %v1086_v14, 8.507059e+37 }
 0x11e   : > { %v1797_v20 = vpop.eup %1796  ;;  %v1070_v0 = vsel %vm1069_vm10, %v1785_v59, %v1066_v17  ;;  %v1078_v43 = vmul.f32 %v1795_v49, %v2661_v46  ;;  %1802 = vrcp.f32 %v2689_v47  ;;  %vm932_vm15 = vweird.f32 %v2680_v55 }
 0x11f   : > { %v1075_v22 = vsel %vm1072_vm11, %v1074_v61, %v1070_v0  ;;  %v1093_v27 = vmul.f32 %v1797_v20, %v2664_v60  ;;  %v1089_v23 = vor.u32 1.1754944e-38, %v1088_v21  ;;  %vm1083_vm2 = vweird.f32 %v1795_v49 }
 0x120   : > { %1232 = vmatpush.msrb.mxu1 %v1075_v22  ;;  %v1079_v6 = vsub.f32 1.0, %v1078_v43  ;;  %vm2710_vm1 = vcmp.eq.f32.partialorder %v1101_v24, 8.507059e+37  ;;  %1804 = vrcp.f32 %v2696_v25  ;;  %vm1098_vm3 = vweird.f32 %v1797_v20  ;;  %vm1084_vm6 = vmor %vm1082_vm13, %vm1083_vm2 }
 0x121   : > { %v1799_v7 = vpop.eup %1798  ;;  %v1094_v35 = vsub.f32 1.0, %v1093_v27  ;;  %v1104_v41 = vor.u32 1.1754944e-38, %v1103_v29  ;;  %vm2715_vm4 = vcmp.eq.f32.partialorder %v936_v30, 8.507059e+37  ;;  %v939_v44 = vor.u32 1.1754944e-38, %v938_v63  ;;  %vm1099_vm7 = vmor %vm1097_vm14, %vm1098_vm3 }
 0x122   : > { %v928_v33 = vmul.f32 %v1799_v7, %v2680_v55  ;;  %v1080_v53 = vmul.f32 %v1795_v49, %v1079_v6  ;;  %vm933_vm5 = vweird.f32 %v1799_v7  ;;  %v951_v18 = vand.u32 2147483647, %v2686_v4 }
 0x123   : > { %v1801_v38 = vpop.eup %1800  ;;  %v1095_v39 = vmul.f32 %v1797_v20, %v1094_v35  ;;  %v953_v54 = vand.u32 2147483648, %v2686_v4  ;;  %v968_v52 = vand.u32 2147483648, %v2689_v47  ;;  %vm934_vm8 = vmor %vm932_vm15, %vm933_vm5  ;;  %vm947_vm10 = vweird.f32 %v2686_v4 }
 0x124   : > { %v929_v26 = vsub.f32 1.0, %v928_v33  ;;  %v943_v32 = vmul.f32 %v1801_v38, %v2686_v4  ;;  %v1081_v45 = vadd.f32 %v1795_v49, %v1080_v53  ;;  %v1803_v13 = vpop.eup %1802  ;;  %vm948_vm9 = vweird.f32 %v1801_v38 }
 0x125   : > { %v1096_v40 = vadd.f32 %v1797_v20, %v1095_v39  ;;  %v958_v57 = vmul.f32 %v1803_v13, %v2689_v47  ;;  %v966_v16 = vand.u32 2147483647, %v2689_v47  ;;  %vm963_vm11 = vweird.f32 %v1803_v13  ;;  %vm949_vm13 = vmor %vm947_vm10, %vm948_vm9 }
 0x126   : > { %v930_v50 = vmul.f32 %v1799_v7, %v929_v26  ;;  %v944_v3 = vsub.f32 1.0, %v943_v32  ;;  %v1085_v56 = vsel %vm1084_vm6, %v1795_v49, %v1081_v45  ;;  %v1805_v59 = vpop.eup %1804  ;;  %vm952_vm14 = vcmp.eq.f32.partialorder %v951_v18, 8.507059e+37 }
 0x127   : > { %v1090_v28 = vsel %vm2704_vm0, %v1089_v23, %v1085_v56  ;;  %v1100_v51 = vsel %vm1099_vm7, %v1797_v20, %v1096_v40  ;;  %v959_v62 = vsub.f32 1.0, %v958_v57  ;;  %v973_v36 = vmul.f32 %v1805_v59, %v2696_v25 }
 0x128   : > { %v931_v58 = vadd.f32 %v1799_v7, %v930_v50  ;;  %v945_v46 = vmul.f32 %v1801_v38, %v944_v3  ;;  %1252 = vmatpush.msrb.mxu2 %v1090_v28  ;;  %v1105_v60 = vsel %vm2710_vm1, %v1104_v41, %v1100_v51  ;;  %v954_v8 = vor.u32 1.1754944e-38, %v953_v54 }
 0x129   : > { %1272 = vmatpush.msrb.mxu3 %v1105_v60  ;;  %v960_v34 = vmul.f32 %v1803_v13, %v959_v62  ;;  %vm962_vm0 = vweird.f32 %v2689_v47  ;;  %v974_v9 = vsub.f32 1.0, %v973_v36  ;;  %v969_v12 = vor.u32 1.1754944e-38, %v968_v52 }
 0x12a   : > { %v935_v2 = vsel %vm934_vm8, %v1799_v7, %v931_v58  ;;  %v946_v5 = vadd.f32 %v1801_v38, %v945_v46  ;;  %v983_v11 = vand.u32 2147483648, %v2696_v25  ;;  %vm964_vm15 = vmor %vm962_vm0, %vm963_vm11  ;;  %vm978_vm2 = vweird.f32 %v1805_v59 }
 0x12b   : > { %v940_v19 = vsel %vm2715_vm4, %v939_v44, %v935_v2  ;;  %v961_v55 = vadd.f32 %v1803_v13, %v960_v34  ;;  %v975_v37 = vmul.f32 %v1805_v59, %v974_v9  ;;  %v981_v17 = vand.u32 2147483647, %v2696_v25 }
 0x12c   : > { %1213 = vmatpush.msrb.mxu0 %v940_v19  ;;  %v950_v48 = vsel %vm949_vm13, %v1801_v38, %v946_v5  ;;  %vm967_vm1 = vcmp.eq.f32.partialorder %v966_v16, 8.507059e+37  ;;  %vm977_vm3 = vweird.f32 %v2696_v25  ;;  %v984_v14 = vor.u32 1.1754944e-38, %v983_v11 }
 0x12d   : > { %1601 = vmatmul.msk.f32.vlgmr.msrb.gmra.mxu0 %vm1114_vm12, %v2596_v10  ;;  %v955_v15 = vsel %vm952_vm14, %v954_v8, %v950_v48  ;;  %v965_v4 = vsel %vm964_vm15, %v1803_v13, %v961_v55  ;;  %v976_v61 = vadd.f32 %v1805_v59, %v975_v37  ;;  %vm979_vm4 = vmor %vm977_vm3, %vm978_vm2  ;;  %vm982_vm5 = vcmp.eq.f32.partialorder %v981_v17, 8.507059e+37 }
 0x12e   : > { %1233 = vmatpush.msrb.mxu1 %v955_v15  ;;  %v970_v49 = vsel %vm967_vm1, %v969_v12, %v965_v4 }
 0x12f   : > { %1602 = vmatmul.msk.f32.vlgmr.msrb.gmra.mxu1 %vm1114_vm12, %v2596_v10  ;;  %1253 = vmatpush.msrb.mxu2 %v970_v49  ;;  %v980_v47 = vsel %vm979_vm4, %v1805_v59, %v976_v61 }
 0x130   : > { %1603 = vmatmul.msk.f32.vlgmr.msrb.gmra.mxu2 %vm1114_vm12, %v2596_v10  ;;  %v985_v20 = vsel %vm982_vm5, %v984_v14, %v980_v47 }
 0x131   : > { %1273 = vmatpush.msrb.mxu3 %v985_v20 }
 0x132   : > { %1604 = vmatmul.msk.f32.vlgmr.msrb.gmra.mxu3 %vm1114_vm12, %v2596_v10 }
 0x181   : > { %v2753_v0 = vpop.permute.xlu1 %1111 }
 0x187   : > { %v1135_v21 = vpop.f32.mrf.mxu0 }
 0x188   : > { %v1136_v22 = vadd.f32 %v1135_v21, %v2753_v0 }
 0x18a   : > { %v1605_v43 = vmul.f32 -1.442695, %v1136_v22 }
 0x18c   : > { %1806 = vpow2.f32 %v1605_v43 }
 0x191   : > { %v1155_v24 = vpop.f32.mrf.mxu1 }
 0x192   : > { %v1807_v25 = vpop.eup %1806  ;;  %v1156_v27 = vadd.f32 %v1155_v24, %v2753_v0 }
 0x193   : > { %v1302_v29 = vadd.f32 1.0, %v1807_v25 }
 0x194   : > { %v1606_v7 = vmul.f32 -1.442695, %v1156_v27 }
 0x195   : > { %1808 = vrcp.f32 %v1302_v29  ;;  %vm1315_vm12 = vweird.f32 %v1302_v29  ;;  %v1321_v23 = vand.u32 2147483648, %v1302_v29  ;;  %v1319_v38 = vand.u32 2147483647, %v1302_v29 }
 0x196   : > { %1810 = vpow2.f32 %v1606_v7 }
 0x197   : > { %v1322_v42 = vor.u32 1.1754944e-38, %v1321_v23  ;;  %vm1320_vm8 = vcmp.eq.f32.partialorder %v1319_v38, 8.507059e+37 }
 0x199   : > { %v1175_v30 = vpop.f32.mrf.mxu2 }
 0x19a   : > { %v1176_v63 = vadd.f32 %v1175_v30, %v2753_v0 }
 0x19b   : > { %v1809_v10 = vpop.eup %1808 }
 0x19c   : > { %v1607_v6 = vmul.f32 -1.442695, %v1176_v63  ;;  %v1811_v31 = vpop.eup %1810  ;;  %v1311_v33 = vmul.f32 %v1809_v10, %v1302_v29  ;;  %vm1316_vm6 = vweird.f32 %v1809_v10 }
 0x19d   : > { %v1303_v35 = vadd.f32 1.0, %v1811_v31  ;;  %vm1317_vm7 = vmor %vm1315_vm12, %vm1316_vm6 }
 0x19e   : > { %1812 = vpow2.f32 %v1607_v6  ;;  %v1195_v53 = vpop.f32.mrf.mxu3  ;;  %v1312_v1 = vsub.f32 1.0, %v1311_v33 }
 0x19f   : > { %v1196_v26 = vadd.f32 %v1195_v53, %v2753_v0  ;;  %1814 = vrcp.f32 %v1303_v35  ;;  %v1336_v3 = vand.u32 2147483648, %v1303_v35  ;;  %vm1330_vm9 = vweird.f32 %v1303_v35 }
 0x1a0   : > { %v1313_v39 = vmul.f32 %v1809_v10, %v1312_v1  ;;  %v1334_v57 = vand.u32 2147483647, %v1303_v35 }
 0x1a1   : > { %v1608_v41 = vmul.f32 -1.442695, %v1196_v26  ;;  %v1337_v59 = vor.u32 1.1754944e-38, %v1336_v3 }
 0x1a2   : > { %v1314_v44 = vadd.f32 %v1809_v10, %v1313_v39  ;;  %vm1335_vm13 = vcmp.eq.f32.partialorder %v1334_v57, 8.507059e+37 }
 0x1a3   : > { %1816 = vpow2.f32 %v1608_v41 }
 0x1a4   : > { %v1813_v32 = vpop.eup %1812  ;;  %v1318_v45 = vsel %vm1317_vm7, %v1809_v10, %v1314_v44 }
 0x1a5   : > { %v1304_v13 = vadd.f32 1.0, %v1813_v32  ;;  %v1815_v50 = vpop.eup %1814  ;;  %v1323_v18 = vsel %vm1320_vm8, %v1322_v42, %v1318_v45 }
 0x1a6   : > { %1430 = vst [vmem:[%s2762_s11] sm:$0xff] %v1323_v18  ;;  %v1326_v40 = vmul.f32 %v1815_v50, %v1303_v35  ;;  %vm1331_vm10 = vweird.f32 %v1815_v50 }
 0x1a7   : > { %1818 = vrcp.f32 %v1304_v13  ;;  %vm1332_vm11 = vmor %vm1330_vm9, %vm1331_vm10  ;;  %v1349_v8 = vand.u32 2147483647, %v1304_v13  ;;  %v1351_v9 = vand.u32 2147483648, %v1304_v13  ;;  %vm1345_vm14 = vweird.f32 %v1304_v13 }
 0x1a8   : > { %v1327_v56 = vsub.f32 1.0, %v1326_v40 }
 0x1a9   : > { %v1817_v54 = vpop.eup %1816  ;;  %vm1350_vm2 = vcmp.eq.f32.partialorder %v1349_v8, 8.507059e+37  ;;  %v1352_v17 = vor.u32 1.1754944e-38, %v1351_v9 }
 0x1aa   : > { %v1305_v58 = vadd.f32 1.0, %v1817_v54  ;;  %v1215_v28 = vpop.f32.mrf.mxu0  ;;  %v1328_v51 = vmul.f32 %v1815_v50, %v1327_v56 }
 0x1ab   : > { %v1216_v52 = vadd.f32 %v1215_v28, %v2753_v0 }
 0x1ac   : > { %1820 = vrcp.f32 %v1305_v58  ;;  %v1329_v60 = vadd.f32 %v1815_v50, %v1328_v51  ;;  %v1235_v2 = vpop.f32.mrf.mxu1  ;;  %vm1360_vm1 = vweird.f32 %v1305_v58  ;;  %v1366_v14 = vand.u32 2147483648, %v1305_v58 }
 0x1ad   : > { %v1819_v46 = vpop.eup %1818  ;;  %v1609_v62 = vmul.f32 -1.442695, %v1216_v52  ;;  %v1236_v19 = vadd.f32 %v1235_v2, %v2753_v0  ;;  %v1364_v43 = vand.u32 2147483647, %v1305_v58 }
 0x1ae   : > { %v1341_v16 = vmul.f32 %v1819_v46, %v1304_v13  ;;  %v1333_v36 = vsel %vm1332_vm11, %v1815_v50, %v1329_v60  ;;  %vm1346_vm0 = vweird.f32 %v1819_v46  ;;  %v1367_v30 = vor.u32 1.1754944e-38, %v1366_v14 }
 0x1af   : > { %1822 = vpow2.f32 %v1609_v62  ;;  %v1338_v5 = vsel %vm1335_vm13, %v1337_v59, %v1333_v36  ;;  %v1610_v48 = vmul.f32 -1.442695, %v1236_v19  ;;  %vm1347_vm15 = vmor %vm1345_vm14, %vm1346_vm0  ;;  %vm1365_vm5 = vcmp.eq.f32.partialorder %v1364_v43, 8.507059e+37 }
 0x1b0   : > { %v1342_v34 = vsub.f32 1.0, %v1341_v16  ;;  %1431 = vst [vmem:[%s2762_s11 + $0x8] sm:$0xff] %v1338_v5 }
 0x1b1   : > { %1824 = vpow2.f32 %v1610_v48 }
 0x1b2   : > { %v1821_v55 = vpop.eup %1820  ;;  %v1343_v12 = vmul.f32 %v1819_v46, %v1342_v34 }
 0x1b3   : > { %v1356_v11 = vmul.f32 %v1821_v55, %v1305_v58  ;;  %v1255_v49 = vpop.f32.mrf.mxu2  ;;  %vm1361_vm3 = vweird.f32 %v1821_v55 }
 0x1b4   : > { %v1344_v15 = vadd.f32 %v1819_v46, %v1343_v12  ;;  %v1256_v20 = vadd.f32 %v1255_v49, %v2753_v0  ;;  %vm1362_vm4 = vmor %vm1360_vm1, %vm1361_vm3 }
 0x1b5   : > { %v1823_v37 = vpop.eup %1822  ;;  %v1357_v4 = vsub.f32 1.0, %v1356_v11  ;;  %v1275_v24 = vpop.f32.mrf.mxu3 }
 0x1b6   : > { %v1348_v61 = vsel %vm1347_vm15, %v1819_v46, %v1344_v15  ;;  %v1306_v47 = vadd.f32 1.0, %v1823_v37  ;;  %v1611_v29 = vmul.f32 -1.442695, %v1256_v20  ;;  %v1276_v7 = vadd.f32 %v1275_v24, %v2753_v0 }
 0x1b7   : > { %v1353_v21 = vsel %vm1350_vm2, %v1352_v17, %v1348_v61  ;;  %v1358_v22 = vmul.f32 %v1821_v55, %v1357_v4  ;;  %v1825_v25 = vpop.eup %1824 }
 0x1b8   : > { %1432 = vst [vmem:[%s2762_s11 + $0x10] sm:$0xff] %v1353_v21  ;;  %1826 = vrcp.f32 %v1306_v47  ;;  %v1307_v63 = vadd.f32 1.0, %v1825_v25  ;;  %v1612_v6 = vmul.f32 -1.442695, %v1276_v7  ;;  %v1379_v35 = vand.u32 2147483647, %v1306_v47 }
 0x1b9   : > { %v1359_v27 = vadd.f32 %v1821_v55, %v1358_v22  ;;  %1828 = vpow2.f32 %v1611_v29  ;;  %v1381_v53 = vand.u32 2147483648, %v1306_v47  ;;  %vm1375_vm12 = vweird.f32 %v1306_v47 }
 0x1ba   : > { %1830 = vrcp.f32 %v1307_v63  ;;  %vm1380_vm7 = vcmp.eq.f32.partialorder %v1379_v35, 8.507059e+37  ;;  %vm1390_vm9 = vweird.f32 %v1307_v63  ;;  %v1394_v32 = vand.u32 2147483647, %v1307_v63 }
 0x1bb   : > { %v1363_v10 = vsel %vm1362_vm4, %v1821_v55, %v1359_v27  ;;  %1832 = vpow2.f32 %v1612_v6  ;;  %v1382_v42 = vor.u32 1.1754944e-38, %v1381_v53  ;;  %v1396_v45 = vand.u32 2147483648, %v1307_v63 }
 0x1bc   : > { %v1368_v31 = vsel %vm1365_vm5, %v1367_v30, %v1363_v10  ;;  %vm1395_vm13 = vcmp.eq.f32.partialorder %v1394_v32, 8.507059e+37 }
 0x1bd   : > { %1433 = vst [vmem:[%s2762_s11 + $0x18] sm:$0xff] %v1368_v31  ;;  %v1397_v56 = vor.u32 1.1754944e-38, %v1396_v45 }
 0x1be   : > { %v1827_v33 = vpop.eup %1826 }
 0x1bf   : > { %v1371_v23 = vmul.f32 %v1827_v33, %v1306_v47  ;;  %v1829_v1 = vpop.eup %1828  ;;  %vm1376_vm6 = vweird.f32 %v1827_v33 }
 0x1c0   : > { %v1831_v0 = vpop.eup %1830  ;;  %v1308_v26 = vadd.f32 1.0, %v1829_v1  ;;  %vm1377_vm8 = vmor %vm1375_vm12, %vm1376_vm6 }
 0x1c1   : > { %v1372_v38 = vsub.f32 1.0, %v1371_v23  ;;  %v1833_v39 = vpop.eup %1832  ;;  %v1386_v44 = vmul.f32 %v1831_v0, %v1307_v63  ;;  %vm1391_vm10 = vweird.f32 %v1831_v0 }
 0x1c2   : > { %1834 = vrcp.f32 %v1308_v26  ;;  %v1309_v18 = vadd.f32 1.0, %v1833_v39  ;;  %vm1392_vm11 = vmor %vm1390_vm9, %vm1391_vm10  ;;  %v1411_v60 = vand.u32 2147483648, %v1308_v26  ;;  %v1409_v16 = vand.u32 2147483647, %v1308_v26 }
 0x1c3   : > { %v1373_v41 = vmul.f32 %v1827_v33, %v1372_v38  ;;  %v1387_v50 = vsub.f32 1.0, %v1386_v44  ;;  %vm1405_vm0 = vweird.f32 %v1308_v26 }
 0x1c4   : > { %1836 = vrcp.f32 %v1309_v18  ;;  %v1426_v5 = vand.u32 2147483648, %v1309_v18  ;;  %v1412_v34 = vor.u32 1.1754944e-38, %v1411_v60  ;;  %v1424_v9 = vand.u32 2147483647, %v1309_v18 }
 0x1c5   : > { %v1374_v13 = vadd.f32 %v1827_v33, %v1373_v41  ;;  %v1388_v3 = vmul.f32 %v1831_v0, %v1387_v50  ;;  %vm1410_vm1 = vcmp.eq.f32.partialorder %v1409_v16, 8.507059e+37  ;;  %vm1420_vm3 = vweird.f32 %v1309_v18 }
 0x1c6   : > { %v1427_v11 = vor.u32 1.1754944e-38, %v1426_v5  ;;  %vm1425_vm5 = vcmp.eq.f32.partialorder %v1424_v9, 8.507059e+37 }
 0x1c7   : > { %v1378_v40 = vsel %vm1377_vm8, %v1827_v33, %v1374_v13  ;;  %v1389_v57 = vadd.f32 %v1831_v0, %v1388_v3 }
 0x1c8   : > { %v1383_v54 = vsel %vm1380_vm7, %v1382_v42, %v1378_v40  ;;  %v1835_v58 = vpop.eup %1834 }
 0x1c9   : > { %1434 = vst [vmem:[%s2762_s11 + $0x20] sm:$0xff] %v1383_v54  ;;  %v1393_v28 = vsel %vm1392_vm11, %v1831_v0, %v1389_v57  ;;  %v1401_v51 = vmul.f32 %v1835_v58, %v1308_v26  ;;  %vm1406_vm14 = vweird.f32 %v1835_v58 }
 0x1ca   : > { %v1398_v52 = vsel %vm1395_vm13, %v1397_v56, %v1393_v28  ;;  %v1837_v59 = vpop.eup %1836  ;;  %vm1407_vm15 = vmor %vm1405_vm0, %vm1406_vm14 }
 0x1cb   : > { %1435 = vst [vmem:[%s2762_s11 + $0x28] sm:$0xff] %v1398_v52  ;;  %v1402_v46 = vsub.f32 1.0, %v1401_v51  ;;  %v1416_v62 = vmul.f32 %v1837_v59, %v1309_v18  ;;  %vm1421_vm2 = vweird.f32 %v1837_v59 }
 0x1cc   : > { %vm1422_vm4 = vmor %vm1420_vm3, %vm1421_vm2 }
 0x1cd   : > { %v1403_v2 = vmul.f32 %v1835_v58, %v1402_v46  ;;  %v1417_v36 = vsub.f32 1.0, %v1416_v62 }
 0x1cf   : > { %v1404_v19 = vadd.f32 %v1835_v58, %v1403_v2  ;;  %v1418_v8 = vmul.f32 %v1837_v59, %v1417_v36 }
 0x1d1   : > { %v1408_v48 = vsel %vm1407_vm15, %v1835_v58, %v1404_v19  ;;  %v1419_v12 = vadd.f32 %v1837_v59, %v1418_v8 }
 0x1d2   : > { %v1413_v55 = vsel %vm1410_vm1, %v1412_v34, %v1408_v48 }
 0x1d3   : > { %1436 = vst [vmem:[%s2762_s11 + $0x30] sm:$0xff] %v1413_v55  ;;  %v1423_v15 = vsel %vm1422_vm4, %v1837_v59, %v1419_v12 }
 0x1d4   : > { %v1428_v37 = vsel %vm1425_vm5, %v1427_v11, %v1423_v15 }
 0x1d5   : > { %1437 = vst [vmem:[%s2762_s11 + $0x38] sm:$0xff] %v1428_v37 }
 0x1d6   : > { %1865 = shalt.err (!%p1862_p5)
}
 0x1d7   : > { %1620 = dma.vmem_to_hbm [thread:$0]  (%p1989_p4), %s1455_s21, 1024, %s1457_s16, %s1439_s17  }
 0x1d8 PF: > { %p1626_p6 = scmp.ge.s32.totalorder %s1916_s23, 2  ;;  %s1468_s9 = sand.u32 1, %s1896_s18  }
 0x1d9   : > { %s1469_s11 = scalar_lea.sflag [#allocation3], %s1468_s9 }
 0x1da   : > { %p1623_p7 = pnand %p1626_p6, %p1996_p8 }
 0x1dc   : > { %p1624_p9 = pneg %p1623_p7 }
 0x1de   : > { %1891 = dma.done.wait (%p1624_p9), %s1469_s11, 1024  }
 0x1df   : > { %1893 = vsyncadd (%p1624_p9), %s1469_s11, 4294966272  ;;  %s18_s23 = sadd.s32 1, %s1916_s23   ;;  %s2900_s18 = smov %s1900_s19 }
 0x1e0   : > { %p15_p10 = scmp.ge.s32.totalorder %s18_s23, 4   ;;  %s2901_s19 = smov %s1904_s20 }
 0x1e1   : > { %s2902_s20 = smov %s2002_s6  ;;  %s2903_s21 = smov %s1912_s22 }
 0x1e2   : > { %s2904_s22 = smov %s2906_s26  ;;  %17 = sbr.rel (!%p15_p10) target bundleno = 4 (0x4), region = 78 }
 0x1e7   :  { %1475 = vsyncpa [#allocation3], 1 }
 0x1e8   :  { %1477 = vsyncpa [#allocation3 + $0x1], 1 }

</bundles_post_ra>
